<compile_context>
chip_gen: v7x
topology: tpu7x:2x2x1
jax: 0.10.0
libtpu: 0.0.40
codegen_flags: <defaults>
</compile_context>

<pallas_src>
import math

import numpy as np
import jax
import jax.numpy as jnp
from jax.experimental import pallas as pl
from jax.experimental.pallas import tpu as pltpu


def _cdiv(a, b):
    return -(-a // b)


def _round_up(v, m):
    return _cdiv(v, m) * m


def _atan2(y, x):
    """Elementwise atan2 from VPU/EUP-friendly ops (quadrant-correct)."""
    ax = jnp.abs(x)
    ay = jnp.abs(y)
    hi = jnp.maximum(ax, ay)
    lo = jnp.minimum(ax, ay)
    # EUP approximate reciprocal instead of a full divide; lo == 0 when hi == 0.
    t = lo * pl.reciprocal(jnp.maximum(hi, 1e-30), approx=True)   # t in [0, 1]
    t2 = t * t
    # Abramowitz & Stegun 4.4.49 odd polynomial for atan on [0, 1], |err| ~ 1e-5.
    p = 0.0208351
    p = p * t2 - 0.0851330
    p = p * t2 + 0.1801410
    p = p * t2 - 0.3302995
    p = p * t2 + 0.9998660
    a = p * t
    a = jnp.where(ay > ax, (np.pi / 2) - a, a)   # |y| > |x| -> complementary angle
    a = jnp.where(x < 0, np.pi - a, a)           # left half-plane
    return jnp.where(y < 0, -a, a)               # lower half-plane sign


def _fft_kernel(m_ref, x_ref, out_ref):
    """(kb*C, n) real slab -> (kb, 2, C, n) [log-amplitude ; phase] of the
    shifted spectrum, via a compensated 3-pass bf16 DFT matmul."""
    n = x_ref.shape[-1]
    kb, _, c, _ = out_ref.shape

    x = x_ref[...]                                        # (kb*c, n) f32
    x_hi = x.astype(jnp.bfloat16)
    x_lo = (x - x_hi.astype(jnp.float32)).astype(jnp.bfloat16)

    m = m_ref[...]                                        # (n, 4n) bf16: [re_hi|im_hi|re_lo|im_lo]
    y_hi = jnp.dot(x_hi, m, preferred_element_type=jnp.float32)             # (rows, 4n)
    y_lo = jnp.dot(x_lo, m[:, :2 * n], preferred_element_type=jnp.float32)  # (rows, 2n)

    # Compensated sum: x@M_re ~= x_hi@re_hi + x_hi@re_lo + x_lo@re_hi (same for im).
    y_re = y_hi[:, :n] + y_hi[:, 2 * n:3 * n] + y_lo[:, :n]
    y_im = y_hi[:, n:2 * n] + y_hi[:, 3 * n:] + y_lo[:, n:2 * n]

    # log(|X| + 1e-10) ~= 0.5*log(|X|^2 + 1e-20)   (exact limits at |X|=0, no sqrt)
    log_amp = 0.5 * jnp.log(y_re * y_re + y_im * y_im + 1e-20)
    phase = _atan2(y_im, y_re)                            # torch.angle(X)

    # Interleave per batch: channels of log-amp then channels of phase, so the
    # HBM output is already torch.cat([log_amp, phase], dim=1) (no XLA concat).
    for j in range(kb):
        out_ref[j, 0, :, :] = log_amp[j * c:(j + 1) * c, :]
        out_ref[j, 1, :, :] = phase[j * c:(j + 1) * c, :]


def _choose_batches_per_step(b, c, max_rows, max_batches=128):
    """Whole batches per grid step.  Slab rows (kb*c) are a multiple of 8 when
    the grid has >1 step; slabs are balanced; >=2 steps when possible so both
    v7x TensorCores get work; batch count capped to bound the unrolled epilogue."""
    q = 8 // math.gcd(c, 8)                               # kb granularity: kb*c % 8 == 0
    cap = max(q, min(max_batches, (max_rows // max(c, 1)) // q * q))
    steps = _cdiv(b, cap)
    if steps == 1 and b >= 2 * q:
        steps = 2                                         # shard across 2 TCs (v7x)
    if steps == 1:
        return b                                          # single full-extent slab, no padding
    return _round_up(_cdiv(b, steps), q)


def enhanced_fft_layer(x, *, max_slices_per_step=512):
    """x: (B, C, H, W) float32 -> (B, 2*C, H, W) float32 [log_amplitude ; phase]."""
    b, c, h, w = x.shape
    n = h * w

    # Shifted 2-D DFT as one (n, n) complex matrix (host-side constant), split
    # into bf16 hi/lo parts and packed as (n, 4n) = [re_hi | im_hi | re_lo | im_lo].
    # NOTE: only intended for small spatial sizes (matrix is (H*W, H*W)).
    fh = np.exp(-2j * np.pi * np.outer(np.arange(h), np.arange(h)) / h)
    fw = np.exp(-2j * np.pi * np.outer(np.arange(w), np.arange(w)) / w)
    m = np.kron(np.roll(fh, h // 2, axis=0), np.roll(fw, w // 2, axis=0)).T
    m_ri = jnp.asarray(np.concatenate([m.real, m.imag], axis=1), jnp.float32)  # (n, 2n)
    m_hi = m_ri.astype(jnp.bfloat16)
    m_lo = (m_ri - m_hi.astype(jnp.float32)).astype(jnp.bfloat16)
    m_packed = jnp.concatenate([m_hi, m_lo], axis=1)                           # (n, 4n) bf16

    # Batch tiling: whole batches per slab, lane-dense (kb*c, n) input rows.
    kb = _choose_batches_per_step(b, c, max_slices_per_step)
    b_pad = _round_up(b, kb)
    xf = x.reshape(b * c, n).astype(jnp.float32)
    if b_pad != b:
        xf = jnp.pad(xf, ((0, (b_pad - b) * c), (0, 0)))

    rows = b_pad * c
    out = pl.pallas_call(
        _fft_kernel,
        grid=(b_pad // kb,),
        in_specs=[pl.BlockSpec((n, 4 * n), lambda i: (0, 0)),      # resident DFT matrix
                  pl.BlockSpec((kb * c, n), lambda i: (i, 0))],    # lane-dense input slab
        out_specs=pl.BlockSpec((kb, 2, c, n), lambda i: (i, 0, 0, 0)),
        out_shape=jax.ShapeDtypeStruct((b_pad, 2, c, n), jnp.float32),
        compiler_params=pltpu.CompilerParams(
            dimension_semantics=("parallel",),
            vmem_limit_bytes=32 * 1024 * 1024),
        cost_estimate=pl.CostEstimate(
            flops=12 * rows * n * n,              # 3 compensated bf16 passes x (re, im)
            transcendentals=2 * rows * n,         # log + approx reciprocal per element
            bytes_accessed=4 * 3 * rows * n + 2 * 4 * n * n),
    )(m_packed, xf)

    if b_pad != b:
        out = out[:b]
    # (b, 2, c, h*w) and (b, 2c, h, w) share the same flat layout -> free reshape.
    return out.reshape(b, 2 * c, h, w)


if __name__ == "__main__":
    key = jax.random.PRNGKey(0)
    x = jax.random.normal(key, (2, 4, 16, 16), dtype=jnp.float32)

    fn = jax.jit(enhanced_fft_layer)
    out = jax.block_until_ready(fn(x))
    assert out.shape == (2, 8, 16, 16), out.shape
    assert out.dtype == jnp.float32

    # Reference check against jnp.fft (same semantics as the torch module).
    xf_ref = jnp.fft.fftshift(jnp.fft.fft2(x), axes=(-2, -1))
    amp_ref = np.abs(np.asarray(xf_ref))
    ref_logamp = np.log(amp_ref + 1e-10)
    got_logamp = np.asarray(out[:, :4])
    # Exclude numerically ill-conditioned near-zero spectrum bins from the log check.
    ok = amp_ref > 1e-3
    np.testing.assert_allclose(got_logamp[ok], ref_logamp[ok], atol=5e-2, rtol=1e-3)

    # Phase check (wrap-aware, only where the spectrum isn't near zero).
    phase_ref = np.angle(np.asarray(xf_ref))
    phase_out = np.asarray(out[:, 4:])
    wrapped = np.abs(np.angle(np.exp(1j * (phase_out - phase_ref))))
    assert np.all(wrapped[amp_ref > 0.5] < 1e-2)

    print("KERNEL_OK")
</pallas_src>

<mosaic_0001>
module attributes {stable_mosaic.version = 11 : i64} {
  func.func @_fft_kernel(%arg0: i32, %arg1: memref<256x1024xbf16, #tpu.memory_space<vmem>>, %arg2: memref<8x256xf32, #tpu.memory_space<vmem>>, %arg3: memref<2x2x4x256xf32, #tpu.memory_space<vmem>>) attributes {dimension_semantics = [#tpu.dimension_semantics<parallel>], iteration_bounds = array<i64: 1>, scalar_prefetch = 0 : i64, scratch_operands = 0 : i64, tpu.core_type = #tpu.core_type<tc>, window_params = [{pipeline_mode = #tpu.pipeline_mode<synchronous>, transform_indices = @transform_0, window_bounds = array<i64: 256, 1024>}, {transform_indices = @transform_1, window_bounds = array<i64: 8, 256>}, {transform_indices = @transform_2, window_bounds = array<i64: 2, 2, 4, 256>}]} {
    %c0 = arith.constant 0 : index
    %c0_0 = arith.constant 0 : index
    %0 = vector.load %arg2[%c0, %c0_0] : memref<8x256xf32, #tpu.memory_space<vmem>>, vector<8x256xf32>
    %1 = arith.truncf %0 : vector<8x256xf32> to vector<8x256xbf16>
    %2 = arith.extf %1 : vector<8x256xbf16> to vector<8x256xf32>
    %3 = arith.subf %0, %2 : vector<8x256xf32>
    %4 = arith.truncf %3 : vector<8x256xf32> to vector<8x256xbf16>
    %c0_1 = arith.constant 0 : index
    %c0_2 = arith.constant 0 : index
    %5 = vector.load %arg1[%c0_1, %c0_2] : memref<256x1024xbf16, #tpu.memory_space<vmem>>, vector<256x1024xbf16>
    %cst = arith.constant dense<0.000000e+00> : vector<8x1024xf32>
    %6 = tpu.matmul %1, %5, %cst {dimension_numbers = #tpu.dot_dimension_numbers<[1], [0], [0], [1], [0, 0, 1, 1], [], []>} : vector<8x256xbf16>, vector<256x1024xbf16>, vector<8x1024xf32> -> vector<8x1024xf32>
    %7 = vector.extract_strided_slice %5 {offsets = [0, 0], sizes = [256, 512], strides = [1, 1]} : vector<256x1024xbf16> to vector<256x512xbf16>
    %cst_3 = arith.constant dense<0.000000e+00> : vector<8x512xf32>
    %8 = tpu.matmul %4, %7, %cst_3 {dimension_numbers = #tpu.dot_dimension_numbers<[1], [0], [0], [1], [0, 0, 1, 1], [], []>} : vector<8x256xbf16>, vector<256x512xbf16>, vector<8x512xf32> -> vector<8x512xf32>
    %9 = vector.extract_strided_slice %6 {offsets = [0, 0], sizes = [8, 256], strides = [1, 1]} : vector<8x1024xf32> to vector<8x256xf32>
    %10 = vector.extract_strided_slice %6 {offsets = [0, 512], sizes = [8, 256], strides = [1, 1]} : vector<8x1024xf32> to vector<8x256xf32>
    %11 = arith.addf %9, %10 : vector<8x256xf32>
    %12 = vector.extract_strided_slice %8 {offsets = [0, 0], sizes = [8, 256], strides = [1, 1]} : vector<8x512xf32> to vector<8x256xf32>
    %13 = arith.addf %11, %12 : vector<8x256xf32>
    %14 = vector.extract_strided_slice %6 {offsets = [0, 256], sizes = [8, 256], strides = [1, 1]} : vector<8x1024xf32> to vector<8x256xf32>
    %15 = vector.extract_strided_slice %6 {offsets = [0, 768], sizes = [8, 256], strides = [1, 1]} : vector<8x1024xf32> to vector<8x256xf32>
    %16 = arith.addf %14, %15 : vector<8x256xf32>
    %17 = vector.extract_strided_slice %8 {offsets = [0, 256], sizes = [8, 256], strides = [1, 1]} : vector<8x512xf32> to vector<8x256xf32>
    %18 = arith.addf %16, %17 : vector<8x256xf32>
    %19 = arith.mulf %13, %13 : vector<8x256xf32>
    %20 = arith.mulf %18, %18 : vector<8x256xf32>
    %21 = arith.addf %19, %20 : vector<8x256xf32>
    %cst_4 = arith.constant 9.99999968E-21 : f32
    %22 = vector.broadcast %cst_4 : f32 to vector<8x256xf32>
    %23 = arith.addf %21, %22 : vector<8x256xf32>
    %24 = math.log %23 : vector<8x256xf32>
    %cst_5 = arith.constant 5.000000e-01 : f32
    %25 = vector.broadcast %cst_5 : f32 to vector<8x256xf32>
    %26 = arith.mulf %25, %24 : vector<8x256xf32>
    %27 = math.absf %13 : vector<8x256xf32>
    %28 = math.absf %18 : vector<8x256xf32>
    %29 = arith.maximumf %27, %28 : vector<8x256xf32>
    %30 = arith.minimumf %27, %28 : vector<8x256xf32>
    %cst_6 = arith.constant 1.000000e-30 : f32
    %31 = vector.broadcast %cst_6 : f32 to vector<8x256xf32>
    %32 = arith.maximumf %29, %31 : vector<8x256xf32>
    %33 = tpu.reciprocal %32 {approx = true} : vector<8x256xf32> -> vector<8x256xf32>
    %34 = arith.mulf %30, %33 : vector<8x256xf32>
    %35 = arith.mulf %34, %34 : vector<8x256xf32>
    %cst_7 = arith.constant 2.083510e-02 : f32
    %36 = vector.broadcast %cst_7 : f32 to vector<8x256xf32>
    %37 = arith.mulf %36, %35 : vector<8x256xf32>
    %cst_8 = arith.constant 8.513300e-02 : f32
    %38 = vector.broadcast %cst_8 : f32 to vector<8x256xf32>
    %39 = arith.subf %37, %38 : vector<8x256xf32>
    %40 = arith.mulf %39, %35 : vector<8x256xf32>
    %cst_9 = arith.constant 1.801410e-01 : f32
    %41 = vector.broadcast %cst_9 : f32 to vector<8x256xf32>
    %42 = arith.addf %40, %41 : vector<8x256xf32>
    %43 = arith.mulf %42, %35 : vector<8x256xf32>
    %cst_10 = arith.constant 0.330299497 : f32
    %44 = vector.broadcast %cst_10 : f32 to vector<8x256xf32>
    %45 = arith.subf %43, %44 : vector<8x256xf32>
    %46 = arith.mulf %45, %35 : vector<8x256xf32>
    %cst_11 = arith.constant 9.998660e-01 : f32
    %47 = vector.broadcast %cst_11 : f32 to vector<8x256xf32>
    %48 = arith.addf %46, %47 : vector<8x256xf32>
    %49 = arith.mulf %48, %34 : vector<8x256xf32>
    %50 = arith.cmpf ogt, %28, %27 : vector<8x256xf32>
    %cst_12 = arith.constant 1.57079637 : f32
    %51 = vector.broadcast %cst_12 : f32 to vector<8x256xf32>
    %52 = arith.subf %51, %49 : vector<8x256xf32>
    %53 = arith.select %50, %52, %49 : vector<8x256xi1>, vector<8x256xf32>
    %cst_13 = arith.constant 0.000000e+00 : f32
    %54 = vector.broadcast %cst_13 : f32 to vector<8x256xf32>
    %55 = arith.cmpf olt, %13, %54 : vector<8x256xf32>
    %cst_14 = arith.constant 3.14159274 : f32
    %56 = vector.broadcast %cst_14 : f32 to vector<8x256xf32>
    %57 = arith.subf %56, %53 : vector<8x256xf32>
    %58 = arith.select %55, %57, %53 : vector<8x256xi1>, vector<8x256xf32>
    %cst_15 = arith.constant 0.000000e+00 : f32
    %59 = vector.broadcast %cst_15 : f32 to vector<8x256xf32>
    %60 = arith.cmpf olt, %18, %59 : vector<8x256xf32>
    %cst_16 = arith.constant 0.000000e+00 : f32
    %61 = vector.broadcast %cst_16 : f32 to vector<8x256xf32>
    %62 = arith.subf %61, %58 : vector<8x256xf32>
    %63 = arith.select %60, %62, %58 : vector<8x256xi1>, vector<8x256xf32>
    %64 = vector.extract_strided_slice %26 {offsets = [0, 0], sizes = [4, 256], strides = [1, 1]} : vector<8x256xf32> to vector<4x256xf32>
    %c0_17 = arith.constant 0 : index
    %c0_18 = arith.constant 0 : index
    %c0_19 = arith.constant 0 : index
    %c0_20 = arith.constant 0 : index
    %65 = vector.load %arg3[%c0_17, %c0_18, %c0_19, %c0_20] : memref<2x2x4x256xf32, #tpu.memory_space<vmem>>, vector<1x1x4x256xf32>
    %66 = vector.shape_cast %65 : vector<1x1x4x256xf32> to vector<4x256xf32>
    %67 = vector.shape_cast %64 : vector<4x256xf32> to vector<1x1x4x256xf32>
    tpu.vector_store %arg3[%c0_17, %c0_18, %c0_19, %c0_20], %67 {strides = array<i32>} : memref<2x2x4x256xf32, #tpu.memory_space<vmem>>, vector<1x1x4x256xf32>,
    %68 = vector.extract_strided_slice %63 {offsets = [0, 0], sizes = [4, 256], strides = [1, 1]} : vector<8x256xf32> to vector<4x256xf32>
    %c0_21 = arith.constant 0 : index
    %c1 = arith.constant 1 : index
    %c0_22 = arith.constant 0 : index
    %c0_23 = arith.constant 0 : index
    %69 = vector.load %arg3[%c0_21, %c1, %c0_22, %c0_23] : memref<2x2x4x256xf32, #tpu.memory_space<vmem>>, vector<1x1x4x256xf32>
    %70 = vector.shape_cast %69 : vector<1x1x4x256xf32> to vector<4x256xf32>
    %71 = vector.shape_cast %68 : vector<4x256xf32> to vector<1x1x4x256xf32>
    tpu.vector_store %arg3[%c0_21, %c1, %c0_22, %c0_23], %71 {strides = array<i32>} : memref<2x2x4x256xf32, #tpu.memory_space<vmem>>, vector<1x1x4x256xf32>,
    %72 = vector.extract_strided_slice %26 {offsets = [4, 0], sizes = [4, 256], strides = [1, 1]} : vector<8x256xf32> to vector<4x256xf32>
    %c1_24 = arith.constant 1 : index
    %c0_25 = arith.constant 0 : index
    %c0_26 = arith.constant 0 : index
    %c0_27 = arith.constant 0 : index
    %73 = vector.load %arg3[%c1_24, %c0_25, %c0_26, %c0_27] : memref<2x2x4x256xf32, #tpu.memory_space<vmem>>, vector<1x1x4x256xf32>
    %74 = vector.shape_cast %73 : vector<1x1x4x256xf32> to vector<4x256xf32>
    %75 = vector.shape_cast %72 : vector<4x256xf32> to vector<1x1x4x256xf32>
    tpu.vector_store %arg3[%c1_24, %c0_25, %c0_26, %c0_27], %75 {strides = array<i32>} : memref<2x2x4x256xf32, #tpu.memory_space<vmem>>, vector<1x1x4x256xf32>,
    %76 = vector.extract_strided_slice %63 {offsets = [4, 0], sizes = [4, 256], strides = [1, 1]} : vector<8x256xf32> to vector<4x256xf32>
    %c1_28 = arith.constant 1 : index
    %c1_29 = arith.constant 1 : index
    %c0_30 = arith.constant 0 : index
    %c0_31 = arith.constant 0 : index
    %77 = vector.load %arg3[%c1_28, %c1_29, %c0_30, %c0_31] : memref<2x2x4x256xf32, #tpu.memory_space<vmem>>, vector<1x1x4x256xf32>
    %78 = vector.shape_cast %77 : vector<1x1x4x256xf32> to vector<4x256xf32>
    %79 = vector.shape_cast %76 : vector<4x256xf32> to vector<1x1x4x256xf32>
    tpu.vector_store %arg3[%c1_28, %c1_29, %c0_30, %c0_31], %79 {strides = array<i32>} : memref<2x2x4x256xf32, #tpu.memory_space<vmem>>, vector<1x1x4x256xf32>,
    return
  }
  func.func @transform_0(%arg0: i32) -> (i32, i32) {
    %c0_i32 = arith.constant 0 : i32
    %c0_i32_0 = arith.constant 0 : i32
    %c0_i32_1 = arith.constant 0 : i32
    return %c0_i32, %c0_i32_0 : i32, i32
  }
  func.func @transform_1(%arg0: i32) -> (i32, i32) {
    %c0_i32 = arith.constant 0 : i32
    %c0_i32_0 = arith.constant 0 : i32
    return %arg0, %c0_i32 : i32, i32
  }
  func.func @transform_2(%arg0: i32) -> (i32, i32, i32, i32) {
    %c0_i32 = arith.constant 0 : i32
    %c0_i32_0 = arith.constant 0 : i32
    %c0_i32_1 = arith.constant 0 : i32
    %c0_i32_2 = arith.constant 0 : i32
    return %arg0, %c0_i32, %c0_i32_0, %c0_i32_1 : i32, i32, i32, i32
  }
}

</mosaic_0001>

<bundles_post_ra>
// kernel: enhanced_fft_layer.1
= control target key start
LH: loop header
LB: loop body
LE: loop exit
PB: predicated region body
PF: predicated region fallthrough
CT: control target
= control target key end

     0   :  { %s2036_s0 = inlined_call_operand.vmem [shape: bf16[256,1024], index: 0, kind: input, shape index: {}]   ;;  %s2037_s1 = inlined_call_operand.vmem [shape: f32[8,256], index: 1, kind: input, shape index: {}]   ;;  %s2038_s2 = inlined_call_operand.vmem [shape: f32[2,2,4,256], index: 2, kind: output, shape index: {}]  }
   0x1   :  { %v21_v0 = vld [vmem:[%s2036_s0] sm:$0xff]  ;;  %v22_v2 = vld [vmem:[%s2036_s0 + $0x8] sm:$0xff] }
   0x2   :  { %v25_v1 = vld [vmem:[%s2036_s0 + $0x20] sm:$0xff]  ;;  %v26_v4 = vld [vmem:[%s2036_s0 + $0x28] sm:$0xff] }
   0x3   :  { %v1315_v3 = vcombine.high %v21_v0, %v25_v1  ;;  %v1320_v5 = vcombine.low %v21_v0, %v25_v1  ;;  %v29_v6 = vld [vmem:[%s2036_s0 + $0x40] sm:$0xff]  ;;  %v1328_v8 = vcombine.high %v22_v2, %v26_v4  ;;  %v1330_v9 = vcombine.low %v22_v2, %v26_v4  ;;  %v30_v11 = vld [vmem:[%s2036_s0 + $0x48] sm:$0xff] }
   0x4   :  { %v33_v7 = vld [vmem:[%s2036_s0 + $0x60] sm:$0xff]  ;;  %v34_v12 = vld [vmem:[%s2036_s0 + $0x68] sm:$0xff] }
   0x5   :  { %v1332_v10 = vcombine.high %v29_v6, %v33_v7  ;;  %v37_v13 = vld [vmem:[%s2036_s0 + $0x80] sm:$0xff]  ;;  %789 = vmatprep.subr.bf16.mxu0 %v1315_v3  ;;  %v1344_v14 = vcombine.high %v30_v11, %v34_v12  ;;  %v38_v16 = vld [vmem:[%s2036_s0 + $0x88] sm:$0xff]  ;;  %830 = vmatprep.subr.bf16.mxu1 %v1328_v8  ;;  %v1357_v18 = vcombine.low %v29_v6, %v33_v7 }
   0x6   :  { %v41_v15 = vld [vmem:[%s2036_s0 + $0xa0] sm:$0xff]  ;;  %v42_v17 = vld [vmem:[%s2036_s0 + $0xa8] sm:$0xff]  ;;  %790 = vmatpush1.bf16.msra.mxu0 %v1320_v5  ;;  %831 = vmatpush1.bf16.msra.mxu1 %v1330_v9  ;;  %v1361_v19 = vcombine.low %v30_v11, %v34_v12 }
   0x7   :  { %791 = vmatprep.subr.bf16.mxu0 %v1332_v10  ;;  %v1363_v20 = vcombine.high %v37_v13, %v41_v15  ;;  %832 = vmatprep.subr.bf16.mxu1 %v1344_v14  ;;  %v1366_v21 = vcombine.high %v38_v16, %v42_v17  ;;  %v45_v22 = vld [vmem:[%s2036_s0 + $0xc0] sm:$0xff]  ;;  %v46_v24 = vld [vmem:[%s2036_s0 + $0xc8] sm:$0xff]  ;;  %v1381_v26 = vcombine.low %v37_v13, %v41_v15 }
   0x8   :  { %v49_v23 = vld [vmem:[%s2036_s0 + $0xe0] sm:$0xff]  ;;  %v50_v25 = vld [vmem:[%s2036_s0 + $0xe8] sm:$0xff]  ;;  %v1385_v27 = vcombine.low %v38_v16, %v42_v17 }
   0x9   :  { %v1387_v28 = vcombine.high %v45_v22, %v49_v23  ;;  %v1390_v29 = vcombine.high %v46_v24, %v50_v25  ;;  %v53_v30 = vld [vmem:[%s2036_s0 + $0x100] sm:$0xff]  ;;  %v54_v32 = vld [vmem:[%s2036_s0 + $0x108] sm:$0xff]  ;;  %v1405_v34 = vcombine.low %v45_v22, %v49_v23  ;;  %v1409_v35 = vcombine.low %v46_v24, %v50_v25 }
   0xa   :  { %792 = vmatpush1.bf16.msra.mxu0 %v1357_v18  ;;  %833 = vmatpush1.bf16.msra.mxu1 %v1361_v19  ;;  %v57_v31 = vld [vmem:[%s2036_s0 + $0x120] sm:$0xff]  ;;  %v58_v33 = vld [vmem:[%s2036_s0 + $0x128] sm:$0xff] }
   0xb   :  { %793 = vmatprep.subr.bf16.mxu0 %v1363_v20  ;;  %834 = vmatprep.subr.bf16.mxu1 %v1366_v21  ;;  %v1411_v36 = vcombine.high %v53_v30, %v57_v31  ;;  %v1414_v37 = vcombine.high %v54_v32, %v58_v33  ;;  %v61_v38 = vld [vmem:[%s2036_s0 + $0x140] sm:$0xff]  ;;  %v62_v40 = vld [vmem:[%s2036_s0 + $0x148] sm:$0xff]  ;;  %v1429_v42 = vcombine.low %v53_v30, %v57_v31 }
   0xc   :  { %v65_v39 = vld [vmem:[%s2036_s0 + $0x160] sm:$0xff]  ;;  %v66_v41 = vld [vmem:[%s2036_s0 + $0x168] sm:$0xff]  ;;  %v1433_v43 = vcombine.low %v54_v32, %v58_v33 }
   0xd   :  { %v1435_v44 = vcombine.high %v61_v38, %v65_v39  ;;  %v1438_v45 = vcombine.high %v62_v40, %v66_v41  ;;  %v69_v46 = vld [vmem:[%s2036_s0 + $0x180] sm:$0xff]  ;;  %v70_v48 = vld [vmem:[%s2036_s0 + $0x188] sm:$0xff]  ;;  %v1453_v50 = vcombine.low %v61_v38, %v65_v39  ;;  %v1457_v51 = vcombine.low %v62_v40, %v66_v41 }
   0xe   :  { %794 = vmatpush1.bf16.msra.mxu0 %v1381_v26  ;;  %835 = vmatpush1.bf16.msra.mxu1 %v1385_v27  ;;  %v73_v47 = vld [vmem:[%s2036_s0 + $0x1a0] sm:$0xff]  ;;  %v74_v49 = vld [vmem:[%s2036_s0 + $0x1a8] sm:$0xff] }
   0xf   :  { %795 = vmatprep.subr.bf16.mxu0 %v1387_v28  ;;  %836 = vmatprep.subr.bf16.mxu1 %v1390_v29  ;;  %v1459_v52 = vcombine.high %v69_v46, %v73_v47  ;;  %v1464_v53 = vld [vmem:[%s2037_s1 + $0x8] sm:$0xff]  ;;  %v1467_v54 = vcombine.high %v70_v48, %v74_v49  ;;  %v77_v55 = vld [vmem:[%s2036_s0 + $0x1c0] sm:$0xff]  ;;  %v1486_v60 = vcombine.low %v69_v46, %v73_v47 }
  0x10   :  { %v81_v56 = vld [vmem:[%s2036_s0 + $0x1e0] sm:$0xff]  ;;  %v1477_v57 = vpack.c.bf16 %v1464_v53, %v1464_v53  ;;  %v78_v58 = vld [vmem:[%s2036_s0 + $0x1c8] sm:$0xff]  ;;  %v1491_v61 = vcombine.low %v70_v48, %v74_v49 }
  0x11   :  { %v82_v59 = vld [vmem:[%s2036_s0 + $0x1e8] sm:$0xff]  ;;  %v1493_v62 = vcombine.high %v77_v55, %v81_v56  ;;  %v85_v0 = vld [vmem:[%s2036_s0 + $0x200] sm:$0xff]  ;;  %v1512_v6 = vcombine.low %v77_v55, %v81_v56 }
  0x12   :  { %796 = vmatpush1.bf16.msra.mxu0 %v1405_v34  ;;  %837 = vmatpush1.bf16.msra.mxu1 %v1409_v35  ;;  %v1496_v63 = vcombine.high %v78_v58, %v82_v59  ;;  %v89_v1 = vld [vmem:[%s2036_s0 + $0x220] sm:$0xff]  ;;  %v86_v2 = vld [vmem:[%s2036_s0 + $0x208] sm:$0xff]  ;;  %v1516_v7 = vcombine.low %v78_v58, %v82_v59 }
  0x13   :  { %797 = vmatprep.subr.bf16.mxu0 %v1411_v36  ;;  %838 = vmatprep.subr.bf16.mxu1 %v1414_v37  ;;  %v90_v4 = vld [vmem:[%s2036_s0 + $0x228] sm:$0xff]  ;;  %v1518_v11 = vcombine.high %v85_v0, %v89_v1  ;;  %v93_v13 = vld [vmem:[%s2036_s0 + $0x240] sm:$0xff]  ;;  %v1536_v22 = vcombine.low %v85_v0, %v89_v1 }
  0x14   :  { %821 = vmatprep.mubr.bf16.mxu0 %v1477_v57  ;;  %862 = vmatprep.mubr.bf16.mxu1 %v1477_v57  ;;  %v1521_v12 = vcombine.high %v86_v2, %v90_v4  ;;  %v97_v15 = vld [vmem:[%s2036_s0 + $0x260] sm:$0xff]  ;;  %v94_v16 = vld [vmem:[%s2036_s0 + $0x248] sm:$0xff]  ;;  %v1540_v23 = vcombine.low %v86_v2, %v90_v4 }
  0x15   :  { %v98_v17 = vld [vmem:[%s2036_s0 + $0x268] sm:$0xff]  ;;  %v1542_v24 = vcombine.high %v93_v13, %v97_v15  ;;  %v101_v30 = vld [vmem:[%s2036_s0 + $0x280] sm:$0xff]  ;;  %v1560_v38 = vcombine.low %v93_v13, %v97_v15 }
  0x16   :  { %798 = vmatpush1.bf16.msra.mxu0 %v1429_v42  ;;  %839 = vmatpush1.bf16.msra.mxu1 %v1433_v43  ;;  %v1545_v25 = vcombine.high %v94_v16, %v98_v17  ;;  %v105_v31 = vld [vmem:[%s2036_s0 + $0x2a0] sm:$0xff]  ;;  %v102_v32 = vld [vmem:[%s2036_s0 + $0x288] sm:$0xff]  ;;  %v1564_v39 = vcombine.low %v94_v16, %v98_v17 }
  0x17   :  { %799 = vmatprep.subr.bf16.mxu0 %v1435_v44  ;;  %840 = vmatprep.subr.bf16.mxu1 %v1438_v45  ;;  %v106_v33 = vld [vmem:[%s2036_s0 + $0x2a8] sm:$0xff]  ;;  %v1566_v40 = vcombine.high %v101_v30, %v105_v31  ;;  %v109_v46 = vld [vmem:[%s2036_s0 + $0x2c0] sm:$0xff]  ;;  %v1584_v55 = vcombine.low %v101_v30, %v105_v31 }
  0x18   :  { %v1569_v41 = vcombine.high %v102_v32, %v106_v33  ;;  %v113_v47 = vld [vmem:[%s2036_s0 + $0x2e0] sm:$0xff]  ;;  %v110_v48 = vld [vmem:[%s2036_s0 + $0x2c8] sm:$0xff]  ;;  %v1588_v56 = vcombine.low %v102_v32, %v106_v33 }
  0x19   :  { %v114_v49 = vld [vmem:[%s2036_s0 + $0x2e8] sm:$0xff]  ;;  %2062 = vst [vmem:[#allocation3_spill] sm:$0xff] %v1584_v55  ;;  %v1590_v58 = vcombine.high %v109_v46, %v113_v47  ;;  %v117_v0 = vld [vmem:[%s2036_s0 + $0x300] sm:$0xff]  ;;  %v1608_v13 = vcombine.low %v109_v46, %v113_v47 }
  0x1a   :  { %800 = vmatpush1.bf16.msra.mxu0 %v1453_v50  ;;  %841 = vmatpush1.bf16.msra.mxu1 %v1457_v51  ;;  %2061 = vst [vmem:[#allocation2_spill] sm:$0xff] %v1569_v41  ;;  %2063 = vst [vmem:[#allocation4_spill] sm:$0xff] %v1588_v56  ;;  %v1593_v59 = vcombine.high %v110_v48, %v114_v49  ;;  %v121_v1 = vld [vmem:[%s2036_s0 + $0x320] sm:$0xff]  ;;  %v118_v2 = vld [vmem:[%s2036_s0 + $0x308] sm:$0xff]  ;;  %v1612_v15 = vcombine.low %v110_v48, %v114_v49 }
  0x1b   :  { %801 = vmatprep.subr.bf16.mxu0 %v1459_v52  ;;  %842 = vmatprep.subr.bf16.mxu1 %v1467_v54  ;;  %2064 = vst [vmem:[#allocation5_spill] sm:$0xff] %v1590_v58  ;;  %v122_v4 = vld [vmem:[%s2036_s0 + $0x328] sm:$0xff]  ;;  %2066 = vst [vmem:[#allocation7_spill] sm:$0xff] %v1608_v13  ;;  %v1614_v16 = vcombine.high %v117_v0, %v121_v1  ;;  %v125_v30 = vld [vmem:[%s2036_s0 + $0x340] sm:$0xff]  ;;  %v1632_v46 = vcombine.low %v117_v0, %v121_v1 }
  0x1c   :  { %2065 = vst [vmem:[#allocation6_spill] sm:$0xff] %v1593_v59  ;;  %2067 = vst [vmem:[#allocation8_spill] sm:$0xff] %v1612_v15  ;;  %v1617_v17 = vcombine.high %v118_v2, %v122_v4  ;;  %v129_v31 = vld [vmem:[%s2036_s0 + $0x360] sm:$0xff]  ;;  %v126_v32 = vld [vmem:[%s2036_s0 + $0x348] sm:$0xff]  ;;  %v1636_v47 = vcombine.low %v118_v2, %v122_v4 }
  0x1d   :  { %2068 = vst [vmem:[#allocation9_spill] sm:$0xff] %v1614_v16  ;;  %v130_v33 = vld [vmem:[%s2036_s0 + $0x368] sm:$0xff]  ;;  %2070 = vst [vmem:[#allocation11_spill] sm:$0xff] %v1632_v46  ;;  %v1638_v48 = vcombine.high %v125_v30, %v129_v31  ;;  %v137_v0 = vld [vmem:[%s2036_s0 + $0x3a0] sm:$0xff]  ;;  %v1656_v4 = vcombine.low %v125_v30, %v129_v31 }
  0x1e   :  { %802 = vmatpush1.bf16.msra.mxu0 %v1486_v60  ;;  %843 = vmatpush1.bf16.msra.mxu1 %v1491_v61  ;;  %2069 = vst [vmem:[#allocation10_spill] sm:$0xff] %v1617_v17  ;;  %2071 = vst [vmem:[#allocation12_spill] sm:$0xff] %v1636_v47  ;;  %v1641_v49 = vcombine.high %v126_v32, %v130_v33  ;;  %v134_v1 = vld [vmem:[%s2036_s0 + $0x388] sm:$0xff]  ;;  %v145_v30 = vld [vmem:[%s2036_s0 + $0x3e0] sm:$0xff] }
  0x1f   :  { %803 = vmatprep.subr.bf16.mxu0 %v1493_v62  ;;  %844 = vmatprep.subr.bf16.mxu1 %v1496_v63  ;;  %2072 = vst [vmem:[#allocation13_spill] sm:$0xff] %v1638_v48  ;;  %v138_v2 = vld [vmem:[%s2036_s0 + $0x3a8] sm:$0xff]  ;;  %2074 = vst [vmem:[#allocation15_spill] sm:$0xff] %v1656_v4 }
  0x20   :  { %2073 = vst [vmem:[#allocation14_spill] sm:$0xff] %v1641_v49  ;;  %v142_v31 = vld [vmem:[%s2036_s0 + $0x3c8] sm:$0xff] }
  0x22   :  { %804 = vmatpush1.bf16.msra.mxu0 %v1512_v6  ;;  %845 = vmatpush1.bf16.msra.mxu1 %v1516_v7 }
  0x23   :  { %805 = vmatprep.subr.bf16.mxu0 %v1518_v11  ;;  %846 = vmatprep.subr.bf16.mxu1 %v1521_v12 }
  0x26   :  { %806 = vmatpush1.bf16.msra.mxu0 %v1536_v22  ;;  %847 = vmatpush1.bf16.msra.mxu1 %v1540_v23 }
  0x27   :  { %807 = vmatprep.subr.bf16.mxu0 %v1542_v24  ;;  %848 = vmatprep.subr.bf16.mxu1 %v1545_v25 }
  0x2a   :  { %808 = vmatpush1.bf16.msra.mxu0 %v1560_v38  ;;  %849 = vmatpush1.bf16.msra.mxu1 %v1564_v39 }
  0x2b   :  { %809 = vmatprep.subr.bf16.mxu0 %v1566_v40  ;;  %850 = vmatprep.subr.bf16.mxu1 %v1569_v41  ;;  %v43_v41 = vld [vmem:[%s2036_s0 + $0xb0] sm:$0xff] }
  0x2e   :  { %810 = vmatpush1.bf16.msra.mxu0 %v1584_v55  ;;  %851 = vmatpush1.bf16.msra.mxu1 %v1588_v56  ;;  %v39_v55 = vld [vmem:[%s2036_s0 + $0x90] sm:$0xff] }
  0x2f   :  { %811 = vmatprep.subr.bf16.mxu0 %v1590_v58  ;;  %852 = vmatprep.subr.bf16.mxu1 %v1593_v59  ;;  %v133_v59 = vld [vmem:[%s2036_s0 + $0x380] sm:$0xff] }
  0x32   :  { %812 = vmatpush1.bf16.msra.mxu0 %v1608_v13  ;;  %853 = vmatpush1.bf16.msra.mxu1 %v1612_v15  ;;  %v1665_v15 = vcombine.high %v134_v1, %v138_v2  ;;  %v141_v13 = vld [vmem:[%s2036_s0 + $0x3c0] sm:$0xff] }
  0x33   :  { %813 = vmatprep.subr.bf16.mxu0 %v1614_v16  ;;  %854 = vmatprep.subr.bf16.mxu1 %v1617_v17  ;;  %v1660_v17 = vcombine.low %v126_v32, %v130_v33  ;;  %v1662_v16 = vcombine.high %v133_v59, %v137_v0  ;;  %v146_v32 = vld [vmem:[%s2036_s0 + $0x3e8] sm:$0xff]  ;;  %v1680_v33 = vcombine.low %v133_v59, %v137_v0  ;;  %v27_v59 = vld [vmem:[%s2036_s0 + $0x30] sm:$0xff]  ;;  %v24_v0 = vld [vmem:[%s2036_s0 + $0x18] sm:$0xff] }
  0x34   :  { %2077 = vst [vmem:[#allocation18_spill] sm:$0xff] %v1665_v15 }
  0x35   :  { %2075 = vst [vmem:[#allocation16_spill] sm:$0xff] %v1660_v17  ;;  %2076 = vst [vmem:[#allocation17_spill] sm:$0xff] %v1662_v16 }
  0x36   :  { %814 = vmatpush1.bf16.msra.mxu0 %v1632_v46  ;;  %855 = vmatpush1.bf16.msra.mxu1 %v1636_v47  ;;  %2078 = vst [vmem:[#allocation19_spill] sm:$0xff] %v1680_v33  ;;  %v1689_v47 = vcombine.high %v142_v31, %v146_v32  ;;  %v23_v46 = vld [vmem:[%s2036_s0 + $0x10] sm:$0xff] }
  0x37   :  { %815 = vmatprep.subr.bf16.mxu0 %v1638_v48  ;;  %856 = vmatprep.subr.bf16.mxu1 %v1641_v49  ;;  %v1684_v49 = vcombine.low %v134_v1, %v138_v2  ;;  %v1686_v48 = vcombine.high %v141_v13, %v145_v30  ;;  %v28_v1 = vld [vmem:[%s2036_s0 + $0x38] sm:$0xff]  ;;  %v1704_v2 = vcombine.low %v141_v13, %v145_v30  ;;  %v31_v13 = vld [vmem:[%s2036_s0 + $0x50] sm:$0xff] }
  0x38   :  { %2081 = vst [vmem:[#allocation22_spill] sm:$0xff] %v1689_v47  ;;  %v1139_v58 = vcombine.high %v24_v0, %v28_v1  ;;  %v35_v30 = vld [vmem:[%s2036_s0 + $0x70] sm:$0xff] }
  0x39   :  { %2079 = vst [vmem:[#allocation20_spill] sm:$0xff] %v1684_v49  ;;  %2080 = vst [vmem:[#allocation21_spill] sm:$0xff] %v1686_v48 }
  0x3a   :  { %816 = vmatpush1.bf16.msra.mxu0 %v1656_v4  ;;  %857 = vmatpush1.bf16.msra.mxu1 %v1660_v17  ;;  %v1137_v17 = vcombine.high %v23_v46, %v27_v59  ;;  %v16_v4 = vunpack.c.l.bf16 %v1477_v57 }
  0x3b   :  { %817 = vmatprep.subr.bf16.mxu0 %v1662_v16  ;;  %858 = vmatprep.subr.bf16.mxu1 %v1665_v15  ;;  %v1709_v15 = vld [vmem:[%s2037_s1] sm:$0xff]  ;;  %v1713_v16 = vcombine.low %v142_v31, %v146_v32  ;;  %v32_v31 = vld [vmem:[%s2036_s0 + $0x58] sm:$0xff] }
  0x3c   :  { %2082 = vst [vmem:[#allocation23_spill] sm:$0xff] %v1709_v15  ;;  %v36_v32 = vld [vmem:[%s2036_s0 + $0x78] sm:$0xff] }
  0x3d   :  { %v1147_v56 = vcombine.high %v32_v31, %v36_v32 }
  0x3e   :  { %818 = vmatpush1.bf16.msra.mxu0 %v1680_v33  ;;  %859 = vmatpush1.bf16.msra.mxu1 %v1684_v49  ;;  %v1725_v49 = vpack.c.bf16 %v1709_v15, %v1709_v15  ;;  %v1138_v33 = vcombine.low %v24_v0, %v28_v1  ;;  %v1145_v15 = vcombine.high %v31_v13, %v35_v30  ;;  %v47_v0 = vld [vmem:[%s2036_s0 + $0xd0] sm:$0xff] }
  0x3f   :  { %819 = vmatprep.subr.bf16.mxu0 %v1686_v48  ;;  %860 = vmatprep.subr.bf16.mxu1 %v1689_v47  ;;  %v1734_v47 = vsub.f32 %v1464_v53, %v16_v4  ;;  %v1136_v48 = vcombine.low %v23_v46, %v27_v59  ;;  %v40_v53 = vld [vmem:[%s2036_s0 + $0x98] sm:$0xff]  ;;  %v1146_v46 = vcombine.low %v32_v31, %v36_v32  ;;  %v51_v1 = vld [vmem:[%s2036_s0 + $0xf0] sm:$0xff] }
  0x40   :  { %v1153_v4 = vcombine.high %v39_v55, %v43_v41  ;;  %v55_v31 = vld [vmem:[%s2036_s0 + $0x110] sm:$0xff] }
  0x41   :  { %v59_v32 = vld [vmem:[%s2036_s0 + $0x130] sm:$0xff] }
  0x42   :  { %820 = vmatpush1.bf16.msra.mxu0 %v1704_v2  ;;  %861 = vmatpush1.bf16.msra.mxu1 %v1713_v16 }
  0x43   :  { %871 = vmatprep.subr.bf16.mxu0 %v1137_v17  ;;  %912 = vmatprep.subr.bf16.mxu1 %v1139_v58  ;;  %v44_v17 = vld [vmem:[%s2036_s0 + $0xb8] sm:$0xff]  ;;  %v1144_v58 = vcombine.low %v31_v13, %v35_v30  ;;  %v1161_v13 = vcombine.high %v47_v0, %v51_v1 }
  0x44   :  { %v1155_v59 = vcombine.high %v40_v53, %v44_v17 }
  0x45   :  { %822 = vmatmul.mubr.bf16.vlgmr.msra.gmra.mrb[0].mxu0 %v1725_v49  ;;  %863 = vmatmul.mubr.bf16.vlgmr.msra.gmra.mrb[0].mxu1 %v1725_v49 }
  0x46   :  { %872 = vmatpush1.bf16.msra.mxu0 %v1136_v48  ;;  %913 = vmatpush1.bf16.msra.mxu1 %v1138_v33  ;;  %v48_v48 = vld [vmem:[%s2036_s0 + $0xd8] sm:$0xff]  ;;  %v1154_v33 = vcombine.low %v40_v53, %v44_v17  ;;  %v1169_v17 = vcombine.high %v55_v31, %v59_v32 }
  0x47   :  { %873 = vmatprep.subr.bf16.mxu0 %v1145_v15  ;;  %914 = vmatprep.subr.bf16.mxu1 %v1147_v56  ;;  %v52_v15 = vld [vmem:[%s2036_s0 + $0xf8] sm:$0xff]  ;;  %v1152_v56 = vcombine.low %v39_v55, %v43_v41  ;;  %v1160_v55 = vcombine.low %v47_v0, %v51_v1  ;;  %v1168_v1 = vcombine.low %v55_v31, %v59_v32 }
  0x48   :  { %903 = vmatprep.mubr.bf16.mxu0 %v1477_v57  ;;  %944 = vmatprep.mubr.bf16.mxu1 %v1477_v57  ;;  %v1163_v30 = vcombine.high %v48_v48, %v52_v15  ;;  %v56_v57 = vld [vmem:[%s2036_s0 + $0x118] sm:$0xff]  ;;  %v1162_v53 = vcombine.low %v48_v48, %v52_v15 }
  0x49   :  { %v60_v41 = vld [vmem:[%s2036_s0 + $0x138] sm:$0xff] }
  0x4a   :  { %874 = vmatpush1.bf16.msra.mxu0 %v1144_v58  ;;  %915 = vmatpush1.bf16.msra.mxu1 %v1146_v46  ;;  %v1171_v58 = vcombine.high %v56_v57, %v60_v41  ;;  %v63_v46 = vld [vmem:[%s2036_s0 + $0x150] sm:$0xff]  ;;  %v68_v0 = vld [vmem:[%s2036_s0 + $0x178] sm:$0xff]  ;;  %v1170_v48 = vcombine.low %v56_v57, %v60_v41 }
  0x4b   :  { %875 = vmatprep.subr.bf16.mxu0 %v1153_v4  ;;  %916 = vmatprep.subr.bf16.mxu1 %v1155_v59  ;;  %v67_v4 = vld [vmem:[%s2036_s0 + $0x170] sm:$0xff]  ;;  %v64_v59 = vld [vmem:[%s2036_s0 + $0x158] sm:$0xff] }
  0x4c   :  { %v1177_v15 = vcombine.high %v63_v46, %v67_v4  ;;  %v76_v31 = vld [vmem:[%s2036_s0 + $0x1b8] sm:$0xff]  ;;  %v1176_v32 = vcombine.low %v63_v46, %v67_v4  ;;  %v1178_v57 = vcombine.low %v64_v59, %v68_v0 }
  0x4d   :  { %v84_v46 = vld [vmem:[%s2036_s0 + $0x1f8] sm:$0xff] }
  0x4e   :  { %876 = vmatpush1.bf16.msra.mxu0 %v1152_v56  ;;  %917 = vmatpush1.bf16.msra.mxu1 %v1154_v33  ;;  %v1179_v56 = vcombine.high %v64_v59, %v68_v0  ;;  %v71_v33 = vld [vmem:[%s2036_s0 + $0x190] sm:$0xff] }
  0x4f   :  { %877 = vmatprep.subr.bf16.mxu0 %v1161_v13  ;;  %918 = vmatprep.subr.bf16.mxu1 %v1163_v30  ;;  %v75_v13 = vld [vmem:[%s2036_s0 + $0x1b0] sm:$0xff]  ;;  %v72_v30 = vld [vmem:[%s2036_s0 + $0x198] sm:$0xff] }
  0x50   :  { %v1185_v41 = vcombine.high %v71_v33, %v75_v13  ;;  %v1184_v4 = vcombine.low %v71_v33, %v75_v13  ;;  %v1186_v59 = vcombine.low %v72_v30, %v76_v31  ;;  %v92_v33 = vld [vmem:[%s2036_s0 + $0x238] sm:$0xff] }
  0x52   :  { %878 = vmatpush1.bf16.msra.mxu0 %v1160_v55  ;;  %919 = vmatpush1.bf16.msra.mxu1 %v1162_v53  ;;  %v1187_v55 = vcombine.high %v72_v30, %v76_v31  ;;  %v79_v53 = vld [vmem:[%s2036_s0 + $0x1d0] sm:$0xff] }
  0x53   :  { %879 = vmatprep.subr.bf16.mxu0 %v1169_v17  ;;  %920 = vmatprep.subr.bf16.mxu1 %v1171_v58  ;;  %v83_v17 = vld [vmem:[%s2036_s0 + $0x1f0] sm:$0xff]  ;;  %v80_v58 = vld [vmem:[%s2036_s0 + $0x1d8] sm:$0xff] }
  0x54   :  { %v1193_v0 = vcombine.high %v79_v53, %v83_v17  ;;  %v1192_v13 = vcombine.low %v79_v53, %v83_v17  ;;  %v1194_v30 = vcombine.low %v80_v58, %v84_v46  ;;  %v100_v53 = vld [vmem:[%s2036_s0 + $0x278] sm:$0xff] }
  0x56   :  { %880 = vmatpush1.bf16.msra.mxu0 %v1168_v1  ;;  %921 = vmatpush1.bf16.msra.mxu1 %v1170_v48  ;;  %v1195_v1 = vcombine.high %v80_v58, %v84_v46  ;;  %v87_v48 = vld [vmem:[%s2036_s0 + $0x210] sm:$0xff] }
  0x57   :  { %881 = vmatprep.subr.bf16.mxu0 %v1177_v15  ;;  %922 = vmatprep.subr.bf16.mxu1 %v1179_v56  ;;  %v91_v15 = vld [vmem:[%s2036_s0 + $0x230] sm:$0xff]  ;;  %v88_v56 = vld [vmem:[%s2036_s0 + $0x218] sm:$0xff] }
  0x58   :  { %v1201_v31 = vcombine.high %v87_v48, %v91_v15  ;;  %v1200_v17 = vcombine.low %v87_v48, %v91_v15  ;;  %v1202_v58 = vcombine.low %v88_v56, %v92_v33  ;;  %v108_v48 = vld [vmem:[%s2036_s0 + $0x2b8] sm:$0xff] }
  0x5a   :  { %882 = vmatpush1.bf16.msra.mxu0 %v1176_v32  ;;  %923 = vmatpush1.bf16.msra.mxu1 %v1178_v57  ;;  %v1203_v32 = vcombine.high %v88_v56, %v92_v33  ;;  %v95_v57 = vld [vmem:[%s2036_s0 + $0x250] sm:$0xff] }
  0x5b   :  { %883 = vmatprep.subr.bf16.mxu0 %v1185_v41  ;;  %924 = vmatprep.subr.bf16.mxu1 %v1187_v55  ;;  %v99_v41 = vld [vmem:[%s2036_s0 + $0x270] sm:$0xff]  ;;  %v96_v55 = vld [vmem:[%s2036_s0 + $0x258] sm:$0xff] }
  0x5c   :  { %v1209_v46 = vcombine.high %v95_v57, %v99_v41  ;;  %v1208_v15 = vcombine.low %v95_v57, %v99_v41  ;;  %v1210_v56 = vcombine.low %v96_v55, %v100_v53  ;;  %v116_v57 = vld [vmem:[%s2036_s0 + $0x2f8] sm:$0xff] }
  0x5e   :  { %884 = vmatpush1.bf16.msra.mxu0 %v1184_v4  ;;  %925 = vmatpush1.bf16.msra.mxu1 %v1186_v59  ;;  %v1211_v4 = vcombine.high %v96_v55, %v100_v53  ;;  %v103_v59 = vld [vmem:[%s2036_s0 + $0x290] sm:$0xff] }
  0x5f   :  { %885 = vmatprep.subr.bf16.mxu0 %v1193_v0  ;;  %926 = vmatprep.subr.bf16.mxu1 %v1195_v1  ;;  %v107_v0 = vld [vmem:[%s2036_s0 + $0x2b0] sm:$0xff]  ;;  %v104_v1 = vld [vmem:[%s2036_s0 + $0x298] sm:$0xff] }
  0x60   :  { %v1217_v33 = vcombine.high %v103_v59, %v107_v0  ;;  %v1216_v41 = vcombine.low %v103_v59, %v107_v0  ;;  %v1218_v55 = vcombine.low %v104_v1, %v108_v48  ;;  %v124_v59 = vld [vmem:[%s2036_s0 + $0x338] sm:$0xff] }
  0x62   :  { %886 = vmatpush1.bf16.msra.mxu0 %v1192_v13  ;;  %927 = vmatpush1.bf16.msra.mxu1 %v1194_v30  ;;  %v1219_v13 = vcombine.high %v104_v1, %v108_v48  ;;  %v111_v30 = vld [vmem:[%s2036_s0 + $0x2d0] sm:$0xff] }
  0x63   :  { %887 = vmatprep.subr.bf16.mxu0 %v1201_v31  ;;  %928 = vmatprep.subr.bf16.mxu1 %v1203_v32  ;;  %v115_v31 = vld [vmem:[%s2036_s0 + $0x2f0] sm:$0xff]  ;;  %v112_v32 = vld [vmem:[%s2036_s0 + $0x2d8] sm:$0xff] }
  0x64   :  { %v1225_v53 = vcombine.high %v111_v30, %v115_v31  ;;  %v1224_v0 = vcombine.low %v111_v30, %v115_v31  ;;  %v1226_v1 = vcombine.low %v112_v32, %v116_v57  ;;  %v132_v30 = vld [vmem:[%s2036_s0 + $0x378] sm:$0xff] }
  0x66   :  { %888 = vmatpush1.bf16.msra.mxu0 %v1200_v17  ;;  %929 = vmatpush1.bf16.msra.mxu1 %v1202_v58  ;;  %v1227_v17 = vcombine.high %v112_v32, %v116_v57  ;;  %v119_v58 = vld [vmem:[%s2036_s0 + $0x310] sm:$0xff] }
  0x67   :  { %889 = vmatprep.subr.bf16.mxu0 %v1209_v46  ;;  %930 = vmatprep.subr.bf16.mxu1 %v1211_v4  ;;  %v123_v46 = vld [vmem:[%s2036_s0 + $0x330] sm:$0xff]  ;;  %v120_v4 = vld [vmem:[%s2036_s0 + $0x318] sm:$0xff] }
  0x68   :  { %v1233_v48 = vcombine.high %v119_v58, %v123_v46  ;;  %v1232_v31 = vcombine.low %v119_v58, %v123_v46  ;;  %v1234_v32 = vcombine.low %v120_v4, %v124_v59  ;;  %v140_v58 = vld [vmem:[%s2036_s0 + $0x3b8] sm:$0xff] }
  0x6a   :  { %890 = vmatpush1.bf16.msra.mxu0 %v1208_v15  ;;  %931 = vmatpush1.bf16.msra.mxu1 %v1210_v56  ;;  %v1235_v15 = vcombine.high %v120_v4, %v124_v59  ;;  %v127_v56 = vld [vmem:[%s2036_s0 + $0x350] sm:$0xff] }
  0x6b   :  { %891 = vmatprep.subr.bf16.mxu0 %v1217_v33  ;;  %932 = vmatprep.subr.bf16.mxu1 %v1219_v13  ;;  %v131_v33 = vld [vmem:[%s2036_s0 + $0x370] sm:$0xff]  ;;  %v128_v13 = vld [vmem:[%s2036_s0 + $0x358] sm:$0xff] }
  0x6c   :  { %v1241_v57 = vcombine.high %v127_v56, %v131_v33  ;;  %v1240_v46 = vcombine.low %v127_v56, %v131_v33  ;;  %v1242_v4 = vcombine.low %v128_v13, %v132_v30  ;;  %v148_v56 = vld [vmem:[%s2036_s0 + $0x3f8] sm:$0xff] }
  0x6e   :  { %892 = vmatpush1.bf16.msra.mxu0 %v1216_v41  ;;  %933 = vmatpush1.bf16.msra.mxu1 %v1218_v55  ;;  %v1243_v41 = vcombine.high %v128_v13, %v132_v30  ;;  %v135_v55 = vld [vmem:[%s2036_s0 + $0x390] sm:$0xff] }
  0x6f   :  { %893 = vmatprep.subr.bf16.mxu0 %v1225_v53  ;;  %934 = vmatprep.subr.bf16.mxu1 %v1227_v17  ;;  %v139_v53 = vld [vmem:[%s2036_s0 + $0x3b0] sm:$0xff]  ;;  %v136_v17 = vld [vmem:[%s2036_s0 + $0x398] sm:$0xff] }
  0x70   :  { %v1249_v59 = vcombine.high %v135_v55, %v139_v53  ;;  %v1248_v33 = vcombine.low %v135_v55, %v139_v53  ;;  %v1250_v13 = vcombine.low %v136_v17, %v140_v58 }
  0x72   :  { %894 = vmatpush1.bf16.msra.mxu0 %v1224_v0  ;;  %935 = vmatpush1.bf16.msra.mxu1 %v1226_v1  ;;  %v1251_v0 = vcombine.high %v136_v17, %v140_v58  ;;  %v143_v1 = vld [vmem:[%s2036_s0 + $0x3d0] sm:$0xff] }
  0x73   :  { %895 = vmatprep.subr.bf16.mxu0 %v1233_v48  ;;  %936 = vmatprep.subr.bf16.mxu1 %v1235_v15  ;;  %v147_v48 = vld [vmem:[%s2036_s0 + $0x3f0] sm:$0xff]  ;;  %v144_v15 = vld [vmem:[%s2036_s0 + $0x3d8] sm:$0xff] }
  0x74   :  { %v1257_v30 = vcombine.high %v143_v1, %v147_v48 }
  0x76   :  { %896 = vmatpush1.bf16.msra.mxu0 %v1232_v31  ;;  %937 = vmatpush1.bf16.msra.mxu1 %v1234_v32  ;;  %v1259_v31 = vcombine.high %v144_v15, %v148_v56  ;;  %v1256_v32 = vcombine.low %v143_v1, %v147_v48 }
  0x77   :  { %897 = vmatprep.subr.bf16.mxu0 %v1241_v57  ;;  %938 = vmatprep.subr.bf16.mxu1 %v1243_v41  ;;  %v1258_v57 = vcombine.low %v144_v15, %v148_v56  ;;  %v20_v41 = vpack.c.bf16 %v1734_v47, %v1734_v47 }
  0x7a   :  { %898 = vmatpush1.bf16.msra.mxu0 %v1240_v46  ;;  %939 = vmatpush1.bf16.msra.mxu1 %v1242_v4 }
  0x7b   :  { %899 = vmatprep.subr.bf16.mxu0 %v1249_v59  ;;  %940 = vmatprep.subr.bf16.mxu1 %v1251_v0 }
  0x7e   :  { %900 = vmatpush1.bf16.msra.mxu0 %v1248_v33  ;;  %941 = vmatpush1.bf16.msra.mxu1 %v1250_v13 }
  0x7f   :  { %901 = vmatprep.subr.bf16.mxu0 %v1257_v30  ;;  %942 = vmatprep.subr.bf16.mxu1 %v1259_v31 }
  0x82   :  { %902 = vmatpush1.bf16.msra.mxu0 %v1256_v32  ;;  %943 = vmatpush1.bf16.msra.mxu1 %v1258_v57 }
  0x83   :  { %953 = vmatprep.subr.bf16.mxu0 %v1315_v3  ;;  %994 = vmatprep.subr.bf16.mxu1 %v1328_v8  ;;  %v2083_v3 = vld [vmem:[#allocation2_spill] sm:$0xff]  ;;  %v2085_v8 = vld [vmem:[#allocation4_spill] sm:$0xff] }
  0x85   :  { %904 = vmatmul.mubr.bf16.vlgmr.msra.gmra.mrb[0].mxu0 %v1725_v49  ;;  %945 = vmatmul.mubr.bf16.vlgmr.msra.gmra.mrb[0].mxu1 %v1725_v49 }
  0x86   :  { %954 = vmatpush1.bf16.msra.mxu0 %v1320_v5  ;;  %995 = vmatpush1.bf16.msra.mxu1 %v1330_v9  ;;  %v2084_v5 = vld [vmem:[#allocation3_spill] sm:$0xff]  ;;  %v2086_v9 = vld [vmem:[#allocation5_spill] sm:$0xff] }
  0x87   :  { %955 = vmatprep.subr.bf16.mxu0 %v1332_v10  ;;  %996 = vmatprep.subr.bf16.mxu1 %v1344_v14  ;;  %v2087_v10 = vld [vmem:[#allocation6_spill] sm:$0xff]  ;;  %v2088_v14 = vld [vmem:[#allocation7_spill] sm:$0xff] }
  0x88   :  { %985 = vmatprep.mubr.bf16.mxu0 %v20_v41  ;;  %1026 = vmatprep.mubr.bf16.mxu1 %v20_v41 }
  0x8a   :  { %956 = vmatpush1.bf16.msra.mxu0 %v1357_v18  ;;  %997 = vmatpush1.bf16.msra.mxu1 %v1361_v19  ;;  %v2089_v18 = vld [vmem:[#allocation8_spill] sm:$0xff]  ;;  %v2090_v19 = vld [vmem:[#allocation9_spill] sm:$0xff] }
  0x8b   :  { %957 = vmatprep.subr.bf16.mxu0 %v1363_v20  ;;  %998 = vmatprep.subr.bf16.mxu1 %v1366_v21  ;;  %v2091_v20 = vld [vmem:[#allocation10_spill] sm:$0xff]  ;;  %v2092_v21 = vld [vmem:[#allocation11_spill] sm:$0xff] }
  0x8e   :  { %958 = vmatpush1.bf16.msra.mxu0 %v1381_v26  ;;  %999 = vmatpush1.bf16.msra.mxu1 %v1385_v27  ;;  %v2093_v26 = vld [vmem:[#allocation12_spill] sm:$0xff]  ;;  %v2094_v27 = vld [vmem:[#allocation13_spill] sm:$0xff] }
  0x8f   :  { %959 = vmatprep.subr.bf16.mxu0 %v1387_v28  ;;  %1000 = vmatprep.subr.bf16.mxu1 %v1390_v29  ;;  %v2095_v28 = vld [vmem:[#allocation14_spill] sm:$0xff]  ;;  %v15_v29 = vunpack.c.l.bf16 %v1725_v49 }
  0x92   :  { %960 = vmatpush1.bf16.msra.mxu0 %v1405_v34  ;;  %1001 = vmatpush1.bf16.msra.mxu1 %v1409_v35  ;;  %v2096_v34 = vld [vmem:[#allocation15_spill] sm:$0xff]  ;;  %v2097_v35 = vld [vmem:[#allocation16_spill] sm:$0xff] }
  0x93   :  { %961 = vmatprep.subr.bf16.mxu0 %v1411_v36  ;;  %1002 = vmatprep.subr.bf16.mxu1 %v1414_v37  ;;  %v2098_v36 = vld [vmem:[#allocation17_spill] sm:$0xff]  ;;  %v2099_v37 = vld [vmem:[#allocation18_spill] sm:$0xff] }
  0x96   :  { %962 = vmatpush1.bf16.msra.mxu0 %v1429_v42  ;;  %1003 = vmatpush1.bf16.msra.mxu1 %v1433_v43  ;;  %v2100_v42 = vld [vmem:[#allocation23_spill] sm:$0xff] }
  0x97   :  { %963 = vmatprep.subr.bf16.mxu0 %v1435_v44  ;;  %1004 = vmatprep.subr.bf16.mxu1 %v1438_v45  ;;  %v17_v43 = vsub.f32 %v2100_v42, %v15_v29  ;;  %v2101_v44 = vld [vmem:[#allocation19_spill] sm:$0xff]  ;;  %v2102_v45 = vld [vmem:[#allocation20_spill] sm:$0xff] }
  0x9a   :  { %964 = vmatpush1.bf16.msra.mxu0 %v1453_v50  ;;  %1005 = vmatpush1.bf16.msra.mxu1 %v1457_v51  ;;  %v2103_v50 = vld [vmem:[#allocation21_spill] sm:$0xff]  ;;  %v2104_v51 = vld [vmem:[#allocation22_spill] sm:$0xff] }
  0x9b   :  { %965 = vmatprep.subr.bf16.mxu0 %v1459_v52  ;;  %1006 = vmatprep.subr.bf16.mxu1 %v1467_v54  ;;  %v19_v52 = vpack.c.bf16 %v17_v43, %v17_v43 }
  0x9e   :  { %966 = vmatpush1.bf16.msra.mxu0 %v1486_v60  ;;  %1007 = vmatpush1.bf16.msra.mxu1 %v1491_v61 }
  0x9f   :  { %967 = vmatprep.subr.bf16.mxu0 %v1493_v62  ;;  %1008 = vmatprep.subr.bf16.mxu1 %v1496_v63 }
  0xa2   :  { %968 = vmatpush1.bf16.msra.mxu0 %v1512_v6  ;;  %1009 = vmatpush1.bf16.msra.mxu1 %v1516_v7 }
  0xa3   :  { %969 = vmatprep.subr.bf16.mxu0 %v1518_v11  ;;  %1010 = vmatprep.subr.bf16.mxu1 %v1521_v12 }
  0xa6   :  { %970 = vmatpush1.bf16.msra.mxu0 %v1536_v22  ;;  %1011 = vmatpush1.bf16.msra.mxu1 %v1540_v23 }
  0xa7   :  { %971 = vmatprep.subr.bf16.mxu0 %v1542_v24  ;;  %1012 = vmatprep.subr.bf16.mxu1 %v1545_v25 }
  0xaa   :  { %972 = vmatpush1.bf16.msra.mxu0 %v1560_v38  ;;  %1013 = vmatpush1.bf16.msra.mxu1 %v1564_v39 }
  0xab   :  { %973 = vmatprep.subr.bf16.mxu0 %v1566_v40  ;;  %1014 = vmatprep.subr.bf16.mxu1 %v2083_v3 }
  0xae   :  { %974 = vmatpush1.bf16.msra.mxu0 %v2084_v5  ;;  %1015 = vmatpush1.bf16.msra.mxu1 %v2085_v8 }
  0xaf   :  { %975 = vmatprep.subr.bf16.mxu0 %v2086_v9  ;;  %1016 = vmatprep.subr.bf16.mxu1 %v2087_v10 }
  0xb2   :  { %976 = vmatpush1.bf16.msra.mxu0 %v2088_v14  ;;  %1017 = vmatpush1.bf16.msra.mxu1 %v2089_v18 }
  0xb3   :  { %977 = vmatprep.subr.bf16.mxu0 %v2090_v19  ;;  %1018 = vmatprep.subr.bf16.mxu1 %v2091_v20 }
  0xb6   :  { %978 = vmatpush1.bf16.msra.mxu0 %v2092_v21  ;;  %1019 = vmatpush1.bf16.msra.mxu1 %v2093_v26 }
  0xb7   :  { %979 = vmatprep.subr.bf16.mxu0 %v2094_v27  ;;  %1020 = vmatprep.subr.bf16.mxu1 %v2095_v28 }
  0xba   :  { %980 = vmatpush1.bf16.msra.mxu0 %v2096_v34  ;;  %1021 = vmatpush1.bf16.msra.mxu1 %v2097_v35 }
  0xbb   :  { %981 = vmatprep.subr.bf16.mxu0 %v2098_v36  ;;  %1022 = vmatprep.subr.bf16.mxu1 %v2099_v37 }
  0xbe   :  { %982 = vmatpush1.bf16.msra.mxu0 %v2101_v44  ;;  %1023 = vmatpush1.bf16.msra.mxu1 %v2102_v45 }
  0xbf   :  { %983 = vmatprep.subr.bf16.mxu0 %v2103_v50  ;;  %1024 = vmatprep.subr.bf16.mxu1 %v2104_v51 }
  0xc2   :  { %984 = vmatpush1.bf16.msra.mxu0 %v1704_v2  ;;  %1025 = vmatpush1.bf16.msra.mxu1 %v1713_v16 }
  0xc5   :  { %986 = vmatmul.mubr.bf16.vlgmr.msra.gmra.mrb[0].mxu0 %v19_v52  ;;  %1027 = vmatmul.mubr.bf16.vlgmr.msra.gmra.mrb[0].mxu1 %v19_v52 }
 0x198   :  { %v1980_v54 = vpop.f32.mrb[0].mxu0  ;;  %v1987_v62 = vpop.f32.mrb[0].mxu1 }
 0x199   :  { %v1043_v60 = vmul.f32 %v1980_v54, %v1980_v54  ;;  %v1985_v61 = vand.u32 2147483647, %v1980_v54  ;;  %v1989_v63 = vpop.f32.mrb[1].mxu0  ;;  %v1045_v6 = vmul.f32 %v1987_v62, %v1987_v62  ;;  %v1994_v7 = vand.u32 2147483647, %v1987_v62  ;;  %v1998_v12 = vpop.f32.mrb[1].mxu1 }
 0x19a   :  { %v1044_v11 = vmul.f32 %v1989_v63, %v1989_v63  ;;  %v991_v22 = vpop.f32.mrb[2].mxu0  ;;  %v2001_v23 = vand.u32 2147483647, %v1989_v63  ;;  %v1046_v24 = vmul.f32 %v1998_v12, %v1998_v12  ;;  %v1060_v25 = vand.u32 2147483647, %v1998_v12  ;;  %v1032_v38 = vpop.f32.mrb[2].mxu1 }
 0x19b   :  { %v1047_v39 = vadd.f32 %v1045_v6, %v1043_v60  ;;  %v1061_v40 = vmax.f32 %v1985_v61, %v1994_v7  ;;  %v1063_v16 = vmin.f32 %v1985_v61, %v1994_v7  ;;  %vm1091_vm0 = vcmp.gt.f32.partialorder %v1994_v7, %v1985_v61  ;;  %v992_v47 = vpop.f32.mrb[3].mxu0  ;;  %v1033_v49 = vpop.f32.mrb[3].mxu1 }
 0x19c   :  { %v1048_v2 = vadd.f32 %v1046_v24, %v1044_v11  ;;  %v1062_v55 = vmax.f32 %v2001_v23, %v1060_v25  ;;  %v1064_v53 = vmin.f32 %v2001_v23, %v1060_v25  ;;  %vm1092_vm1 = vcmp.gt.f32.partialorder %v1060_v25, %v2001_v23 }
 0x19d   :  { %v1049_v17 = vadd.f32 1e-20, %v1047_v39  ;;  %v1065_v58 = vmax.f32 %v1061_v40, 1e-30  ;;  %vm1097_vm2 = vcmp.lt.f32.partialorder %v1980_v54, 0.0  ;;  %vm1098_vm3 = vcmp.lt.f32.partialorder %v1989_v63, 0.0 }
 0x19e   :  { %v1050_v46 = vadd.f32 1e-20, %v1048_v2  ;;  %v1066_v4 = vmax.f32 %v1062_v55, 1e-30  ;;  %vm1103_vm4 = vcmp.lt.f32.partialorder %v1987_v62, 0.0  ;;  %vm1104_vm5 = vcmp.lt.f32.partialorder %v1998_v12, 0.0 }
 0x19f   :  { %1283 = vlog2.f32 %v1049_v17 }
 0x1a0   :  { %1285 = vrcp.f32 %v1065_v58 }
 0x1a1   :  { %1287 = vlog2.f32 %v1050_v46 }
 0x1a2   :  { %1289 = vrcp.f32 %v1066_v4 }
 0x1a9   :  { %v1284_v59 = vpop.eup %1283 }
 0x1aa   :  { %v1286_v0 = vpop.eup %1285  ;;  %v1052_v1 = vmul.f32 0.6931472, %v1284_v59 }
 0x1ab   :  { %v1288_v48 = vpop.eup %1287  ;;  %v1069_v15 = vmul.f32 %v1286_v0, %v1063_v16 }
 0x1ac   :  { %v1290_v56 = vpop.eup %1289  ;;  %v1055_v33 = vmul.f32 0.5, %v1052_v1  ;;  %v1054_v13 = vmul.f32 0.6931472, %v1288_v48 }
 0x1ad   :  { %v1071_v30 = vmul.f32 %v1069_v15, %v1069_v15  ;;  %v1070_v31 = vmul.f32 %v1290_v56, %v1064_v53 }
 0x1ae   :  { %v1056_v32 = vmul.f32 0.5, %v1054_v13 }
 0x1af   :  { %v1073_v57 = vmul.f32 0.0208351, %v1071_v30  ;;  %v1072_v41 = vmul.f32 %v1070_v31, %v1070_v31 }
 0x1b0   :  { %v1111_v3 = vcombine.low %v1055_v33, %v1056_v32  ;;  %v1120_v5 = vcombine.high %v1055_v33, %v1056_v32 }
 0x1b1   :  { %v1260_v8 = vadd.f32 -0.085133, %v1073_v57  ;;  %v1074_v9 = vmul.f32 0.0208351, %v1072_v41 }
 0x1b2   :  { %1113 = vst [vmem:[%s2038_s2] sm:$0xff] %v1111_v3  ;;  %1265 = vst [vmem:[%s2038_s2 + $0x10] sm:$0xff] %v1120_v5 }
 0x1b3   :  { %v1077_v10 = vmul.f32 %v1260_v8, %v1071_v30  ;;  %v1261_v14 = vadd.f32 -0.085133, %v1074_v9 }
 0x1b5   :  { %v1079_v18 = vadd.f32 0.180141, %v1077_v10  ;;  %v1078_v19 = vmul.f32 %v1261_v14, %v1072_v41 }
 0x1b7   :  { %v1081_v20 = vmul.f32 %v1079_v18, %v1071_v30  ;;  %v1080_v21 = vadd.f32 0.180141, %v1078_v19 }
 0x1b9   :  { %v1262_v26 = vadd.f32 -0.3302995, %v1081_v20  ;;  %v1082_v27 = vmul.f32 %v1080_v21, %v1072_v41 }
 0x1bb   :  { %v1085_v28 = vmul.f32 %v1262_v26, %v1071_v30  ;;  %v1263_v29 = vadd.f32 -0.3302995, %v1082_v27 }
 0x1bd   :  { %v1087_v34 = vadd.f32 0.999866, %v1085_v28  ;;  %v1086_v35 = vmul.f32 %v1263_v29, %v1072_v41 }
 0x1bf   :  { %v1089_v36 = vmul.f32 %v1087_v34, %v1069_v15  ;;  %v1088_v37 = vadd.f32 0.999866, %v1086_v35 }
 0x1c1   :  { %v1093_v42 = vsub.f32 1.5707964, %v1089_v36  ;;  %v1090_v43 = vmul.f32 %v1088_v37, %v1070_v31 }
 0x1c3   :  { %v1095_v44 = vsel %vm1091_vm0, %v1093_v42, %v1089_v36  ;;  %v1094_v45 = vsub.f32 1.5707964, %v1090_v43 }
 0x1c4   :  { %v1099_v50 = vsub.f32 3.1415927, %v1095_v44 }
 0x1c5   :  { %v1096_v51 = vsel %vm1092_vm1, %v1094_v45, %v1090_v43 }
 0x1c6   :  { %v1101_v52 = vsel %vm1097_vm2, %v1099_v50, %v1095_v44  ;;  %v1100_v60 = vsub.f32 3.1415927, %v1096_v51 }
 0x1c7   :  { %v1105_v6 = vsub.f32 0.0, %v1101_v52 }
 0x1c8   :  { %v1102_v11 = vsel %vm1098_vm3, %v1100_v60, %v1096_v51 }
 0x1c9   :  { %v1107_v22 = vsel %vm1103_vm4, %v1105_v6, %v1101_v52  ;;  %v1106_v24 = vsub.f32 0.0, %v1102_v11 }
 0x1cb   :  { %v1108_v61 = vsel %vm1104_vm5, %v1106_v24, %v1102_v11 }
 0x1cc   :  { %v1116_v7 = vcombine.low %v1107_v22, %v1108_v61  ;;  %v1124_v38 = vcombine.high %v1107_v22, %v1108_v61 }
 0x1ce   :  { %1264 = vst [vmem:[%s2038_s2 + $0x8] sm:$0xff] %v1116_v7  ;;  %1266 = vst [vmem:[%s2038_s2 + $0x18] sm:$0xff] %v1124_v38 }

</bundles_post_ra>
